<compile_context>
chip_gen: v7x
topology: tpu7x:2x2x1
jax: 0.10.0
libtpu: 0.0.40
codegen_flags: <defaults>
</compile_context>

<pallas_src>
import functools

import jax
import jax.numpy as jnp
from jax.experimental import pallas as pl
from jax.experimental.pallas import tpu as pltpu


def _emotion_head_kernel(h_ref, w1_ref, b1_ref, w2_ref, b2_ref, out_ref, acc_ref,
                         *, inv_t):
    # h_ref: (TB, TT, H) activation tile; acc_ref: (TB, H) f32 running sum.
    t = pl.program_id(1)

    @pl.when(t == 0)
    def _init():
        acc_ref[...] = jnp.zeros_like(acc_ref)

    # Running sum over this sequence tile; always accumulate in f32.
    acc_ref[...] += jnp.sum(h_ref[...].astype(jnp.float32), axis=1)

    @pl.when(t == pl.num_programs(1) - 1)
    def _finalize():
        pooled = acc_ref[...] * inv_t                               # mean over T, (TB, H)

        # Linear(H, 256) + ReLU
        z = jnp.dot(pooled, w1_ref[...], preferred_element_type=jnp.float32)
        z = jnp.maximum(z + b1_ref[...], 0.0)

        # Dropout(0.3) -> identity at inference time.

        # Linear(256, num_labels)
        logits = jnp.dot(z, w2_ref[...], preferred_element_type=jnp.float32)
        out_ref[...] = (logits + b2_ref[...]).astype(out_ref.dtype)


def _largest_aligned_divisor(n, target, align):
    """Largest divisor of n that is <= target and a multiple of `align`.
    Falls back to the full axis if no such divisor exists."""
    if n <= target:
        return n
    for d in range(min(target, n), align - 1, -1):
        if n % d == 0 and d % align == 0:
            return d
    return n


def _batch_tile(b):
    # Split the batch into two parallel grid steps when it is big enough so that
    # v7x's two TensorCores each take half of the HBM stream. Harmless elsewhere.
    if b >= 16 and b % 16 == 0:
        return b // 2
    return b


def emotion_recognition_forward(hidden_states, w1, b1, w2, b2,
                                *, t_tile=None, b_tile=None):
    """Mean-pool over sequence + classifier MLP.

    hidden_states: (B, T, H) float32 or bfloat16 (wav2vec2 last_hidden_state).
    w1: (H, C1), b1: (C1,), w2: (C1, L), b2: (L,)  -- (in, out) layout, i.e.
    the transpose of PyTorch nn.Linear.weight.
    """
    B, T, H = hidden_states.shape
    C1 = w1.shape[1]
    L = w2.shape[1]

    TT = t_tile if t_tile is not None else _largest_aligned_divisor(T, 512, 8)
    TB = b_tile if b_tile is not None else _batch_tile(B)
    assert T % TT == 0 and B % TB == 0, "tile sizes must divide the array dims"

    b1_2d = b1.reshape(1, C1)
    b2_2d = b2.reshape(1, L)

    # VMEM budget: double-buffered activation tile + resident classifier params
    # + f32 accumulator + output tile, with headroom; capped at v7x physical VMEM.
    h_itemsize = jnp.dtype(hidden_states.dtype).itemsize
    vmem_bytes = (
        2 * TB * TT * H * h_itemsize
        + 2 * (H * C1 + C1 + C1 * L + L) * 4
        + TB * H * 4
        + 2 * TB * L * 4
    )
    vmem_limit = min(max(vmem_bytes + (8 << 20), 32 << 20), 64 << 20)

    kernel = functools.partial(_emotion_head_kernel, inv_t=1.0 / T)

    return pl.pallas_call(
        kernel,
        out_shape=jax.ShapeDtypeStruct((B, L), jnp.float32),
        grid=(B // TB, T // TT),
        in_specs=[
            # Lane-dense tiles: H is kept whole (never split), only B/T are tiled.
            pl.BlockSpec((TB, TT, H), lambda b, t: (b, t, 0)),
            pl.BlockSpec((H, C1), lambda b, t: (0, 0)),
            pl.BlockSpec((1, C1), lambda b, t: (0, 0)),
            pl.BlockSpec((C1, L), lambda b, t: (0, 0)),
            pl.BlockSpec((1, L), lambda b, t: (0, 0)),
        ],
        out_specs=pl.BlockSpec((TB, L), lambda b, t: (b, 0)),
        scratch_shapes=[pltpu.VMEM((TB, H), jnp.float32)],
        compiler_params=pltpu.CompilerParams(
            dimension_semantics=("parallel", "arbitrary"),
            vmem_limit_bytes=vmem_limit,
        ),
    )(hidden_states, w1, b1_2d, w2, b2_2d)


def reference_forward(hidden_states, w1, b1, w2, b2):
    pooled = jnp.mean(hidden_states.astype(jnp.float32), axis=1)
    z = jnp.maximum(pooled @ w1 + b1, 0.0)
    return z @ w2 + b2


if __name__ == "__main__":
    # Small shapes consistent with the module: hidden=32 stands in for wav2vec2's
    # 768, classifier hidden=256 (as in the module), num_labels=8.
    B, H = 2, 32
    C1 = 256
    NUM_LABELS = 8

    key = jax.random.PRNGKey(0)
    k_h1, k_h2, k_w1, k_b1, k_w2, k_b2 = jax.random.split(key, 6)

    # PyTorch nn.Linear stores weight as (out, in); build that way, transpose to (in, out).
    w1_pt = jax.random.normal(k_w1, (C1, H), dtype=jnp.float32) * 0.05
    b1 = jax.random.normal(k_b1, (C1,), dtype=jnp.float32) * 0.05
    w2_pt = jax.random.normal(k_w2, (NUM_LABELS, C1), dtype=jnp.float32) * 0.05
    b2 = jax.random.normal(k_b2, (NUM_LABELS,), dtype=jnp.float32) * 0.05
    w1 = w1_pt.T  # (H, C1)
    w2 = w2_pt.T  # (C1, L)

    # Test 1: single-tile case (seq=8 -> one T step).
    h1 = jax.random.normal(k_h1, (B, 8, H), dtype=jnp.float32)
    out1 = jax.block_until_ready(emotion_recognition_forward(h1, w1, b1, w2, b2))
    ref1 = reference_forward(h1, w1, b1, w2, b2)
    assert out1.shape == (B, NUM_LABELS)
    assert jnp.allclose(out1, ref1, atol=1e-4, rtol=1e-4)

    # Test 2: multi-tile reduction over the sequence axis (seq=32, T tile=8 -> 4 steps).
    h2 = jax.random.normal(k_h2, (B, 32, H), dtype=jnp.float32)
    out2 = jax.block_until_ready(
        emotion_recognition_forward(h2, w1, b1, w2, b2, t_tile=8))
    ref2 = reference_forward(h2, w1, b1, w2, b2)
    assert out2.shape == (B, NUM_LABELS)
    assert jnp.allclose(out2, ref2, atol=1e-4, rtol=1e-4)

    print("KERNEL_OK")
</pallas_src>

<mosaic_0001>
module attributes {stable_mosaic.version = 11 : i64} {
  func.func @_emotion_head_kernel(%arg0: i32, %arg1: i32, %arg2: memref<2x8x32xf32, #tpu.memory_space<vmem>>, %arg3: memref<32x256xf32, #tpu.memory_space<vmem>>, %arg4: memref<1x256xf32, #tpu.memory_space<vmem>>, %arg5: memref<256x8xf32, #tpu.memory_space<vmem>>, %arg6: memref<1x8xf32, #tpu.memory_space<vmem>>, %arg7: memref<2x8xf32, #tpu.memory_space<vmem>>, %arg8: memref<2x32xf32, #tpu.memory_space<vmem>>) attributes {dimension_semantics = [#tpu.dimension_semantics<parallel>, #tpu.dimension_semantics<arbitrary>], iteration_bounds = array<i64: 1, 1>, scalar_prefetch = 0 : i64, scratch_operands = 1 : i64, tpu.core_type = #tpu.core_type<tc>, window_params = [{transform_indices = @transform_0, window_bounds = array<i64: 2, 8, 32>}, {pipeline_mode = #tpu.pipeline_mode<synchronous>, transform_indices = @transform_1, window_bounds = array<i64: 32, 256>}, {pipeline_mode = #tpu.pipeline_mode<synchronous>, transform_indices = @transform_2, window_bounds = array<i64: 1, 256>}, {pipeline_mode = #tpu.pipeline_mode<synchronous>, transform_indices = @transform_3, window_bounds = array<i64: 256, 8>}, {pipeline_mode = #tpu.pipeline_mode<synchronous>, transform_indices = @transform_4, window_bounds = array<i64: 1, 8>}, {transform_indices = @transform_5, window_bounds = array<i64: 2, 8>}]} {
    %c0_i32 = arith.constant 0 : i32
    %0 = arith.cmpi eq, %arg1, %c0_i32 : i32
    %1 = arith.extui %0 : i1 to i32
    %c0_i32_0 = arith.constant 0 : i32
    %2 = arith.cmpi ne, %1, %c0_i32_0 : i32
    scf.if %2 {
      %cst_9 = arith.constant 0.000000e+00 : f32
      %11 = vector.broadcast %cst_9 : f32 to vector<2x32xf32>
      %c0_10 = arith.constant 0 : index
      %c0_11 = arith.constant 0 : index
      %12 = vector.load %arg8[%c0_10, %c0_11] : memref<2x32xf32, #tpu.memory_space<vmem>>, vector<2x32xf32>
      tpu.vector_store %arg8[%c0_10, %c0_11], %11 {strides = array<i32>} : memref<2x32xf32, #tpu.memory_space<vmem>>, vector<2x32xf32>,
    } else {
    }
    %c0 = arith.constant 0 : index
    %c0_1 = arith.constant 0 : index
    %3 = vector.load %arg8[%c0, %c0_1] : memref<2x32xf32, #tpu.memory_space<vmem>>, vector<2x32xf32>
    %c0_2 = arith.constant 0 : index
    %c0_3 = arith.constant 0 : index
    %c0_4 = arith.constant 0 : index
    %4 = vector.load %arg2[%c0_2, %c0_3, %c0_4] : memref<2x8x32xf32, #tpu.memory_space<vmem>>, vector<2x8x32xf32>
    %cst = arith.constant dense<0.000000e+00> : vector<2x32xf32>
    %5 = vector.multi_reduction <add>, %4, %cst [1] : vector<2x8x32xf32> to vector<2x32xf32>
    %6 = arith.addf %3, %5 : vector<2x32xf32>
    %c0_5 = arith.constant 0 : index
    %c0_6 = arith.constant 0 : index
    %7 = vector.load %arg8[%c0_5, %c0_6] : memref<2x32xf32, #tpu.memory_space<vmem>>, vector<2x32xf32>
    tpu.vector_store %arg8[%c0_5, %c0_6], %6 {strides = array<i32>} : memref<2x32xf32, #tpu.memory_space<vmem>>, vector<2x32xf32>,
    %c0_i32_7 = arith.constant 0 : i32
    %8 = arith.cmpi eq, %arg1, %c0_i32_7 : i32
    %9 = arith.extui %8 : i1 to i32
    %c0_i32_8 = arith.constant 0 : i32
    %10 = arith.cmpi ne, %9, %c0_i32_8 : i32
    scf.if %10 {
      %c0_9 = arith.constant 0 : index
      %c0_10 = arith.constant 0 : index
      %11 = vector.load %arg8[%c0_9, %c0_10] : memref<2x32xf32, #tpu.memory_space<vmem>>, vector<2x32xf32>
      %cst_11 = arith.constant 1.250000e-01 : f32
      %12 = vector.broadcast %cst_11 : f32 to vector<2x32xf32>
      %13 = arith.mulf %11, %12 : vector<2x32xf32>
      %c0_12 = arith.constant 0 : index
      %c0_13 = arith.constant 0 : index
      %14 = vector.load %arg3[%c0_12, %c0_13] : memref<32x256xf32, #tpu.memory_space<vmem>>, vector<32x256xf32>
      %cst_14 = arith.constant dense<0.000000e+00> : vector<2x256xf32>
      %15 = tpu.matmul %13, %14, %cst_14 {dimension_numbers = #tpu.dot_dimension_numbers<[1], [0], [0], [1], [0, 0, 1, 1], [], []>} : vector<2x32xf32>, vector<32x256xf32>, vector<2x256xf32> -> vector<2x256xf32>
      %c0_15 = arith.constant 0 : index
      %c0_16 = arith.constant 0 : index
      %16 = vector.load %arg4[%c0_15, %c0_16] : memref<1x256xf32, #tpu.memory_space<vmem>>, vector<1x256xf32>
      %17 = vector.broadcast %16 : vector<1x256xf32> to vector<2x256xf32>
      %18 = arith.addf %15, %17 : vector<2x256xf32>
      %cst_17 = arith.constant 0.000000e+00 : f32
      %19 = vector.broadcast %cst_17 : f32 to vector<2x256xf32>
      %20 = arith.maximumf %18, %19 : vector<2x256xf32>
      %c0_18 = arith.constant 0 : index
      %c0_19 = arith.constant 0 : index
      %21 = vector.load %arg5[%c0_18, %c0_19] : memref<256x8xf32, #tpu.memory_space<vmem>>, vector<256x8xf32>
      %cst_20 = arith.constant dense<0.000000e+00> : vector<2x8xf32>
      %22 = tpu.matmul %20, %21, %cst_20 {dimension_numbers = #tpu.dot_dimension_numbers<[1], [0], [0], [1], [0, 0, 1, 1], [], []>} : vector<2x256xf32>, vector<256x8xf32>, vector<2x8xf32> -> vector<2x8xf32>
      %c0_21 = arith.constant 0 : index
      %c0_22 = arith.constant 0 : index
      %23 = vector.load %arg6[%c0_21, %c0_22] : memref<1x8xf32, #tpu.memory_space<vmem>>, vector<1x8xf32>
      %24 = vector.broadcast %23 : vector<1x8xf32> to vector<2x8xf32>
      %25 = arith.addf %22, %24 : vector<2x8xf32>
      %c0_23 = arith.constant 0 : index
      %c0_24 = arith.constant 0 : index
      %26 = vector.load %arg7[%c0_23, %c0_24] : memref<2x8xf32, #tpu.memory_space<vmem>>, vector<2x8xf32>
      tpu.vector_store %arg7[%c0_23, %c0_24], %25 {strides = array<i32>} : memref<2x8xf32, #tpu.memory_space<vmem>>, vector<2x8xf32>,
    } else {
    }
    return
  }
  func.func @transform_0(%arg0: i32, %arg1: i32) -> (i32, i32, i32) {
    %c0_i32 = arith.constant 0 : i32
    %c0_i32_0 = arith.constant 0 : i32
    return %arg0, %arg1, %c0_i32 : i32, i32, i32
  }
  func.func @transform_1(%arg0: i32, %arg1: i32) -> (i32, i32) {
    %c0_i32 = arith.constant 0 : i32
    %c0_i32_0 = arith.constant 0 : i32
    %c0_i32_1 = arith.constant 0 : i32
    return %c0_i32, %c0_i32_0 : i32, i32
  }
  func.func @transform_2(%arg0: i32, %arg1: i32) -> (i32, i32) {
    %c0_i32 = arith.constant 0 : i32
    %c0_i32_0 = arith.constant 0 : i32
    %c0_i32_1 = arith.constant 0 : i32
    return %c0_i32, %c0_i32_0 : i32, i32
  }
  func.func @transform_3(%arg0: i32, %arg1: i32) -> (i32, i32) {
    %c0_i32 = arith.constant 0 : i32
    %c0_i32_0 = arith.constant 0 : i32
    %c0_i32_1 = arith.constant 0 : i32
    return %c0_i32, %c0_i32_0 : i32, i32
  }
  func.func @transform_4(%arg0: i32, %arg1: i32) -> (i32, i32) {
    %c0_i32 = arith.constant 0 : i32
    %c0_i32_0 = arith.constant 0 : i32
    %c0_i32_1 = arith.constant 0 : i32
    return %c0_i32, %c0_i32_0 : i32, i32
  }
  func.func @transform_5(%arg0: i32, %arg1: i32) -> (i32, i32) {
    %c0_i32 = arith.constant 0 : i32
    %c0_i32_0 = arith.constant 0 : i32
    return %arg0, %c0_i32 : i32, i32
  }
}

</mosaic_0001>

<bundles_post_ra>
// kernel: tpu_custom_call.1
= control target key start
LH: loop header
LB: loop body
LE: loop exit
PB: predicated region body
PF: predicated region fallthrough
CT: control target
= control target key end

     0   :  { %vm25_vm0 = vcmask 254976   ;;  %vm30_vm1 = vcmask 261120   ;;  %v382_v7 = vmov 0.0   ;;  %s563_s0 = inlined_call_operand.vmem [shape: f32[2,8,32], index: 0, kind: input, shape index: {}]   ;;  %s564_s1 = inlined_call_operand.vmem [shape: f32[32,256], index: 1, kind: input, shape index: {}]   ;;  %s565_s2 = inlined_call_operand.vmem [shape: f32[1,256], index: 2, kind: input, shape index: {}]   ;;  %s566_s3 = inlined_call_operand.vmem [shape: f32[256,8], index: 3, kind: input, shape index: {}]   ;;  %s567_s4 = inlined_call_operand.vmem [shape: f32[1,8], index: 4, kind: input, shape index: {}]   ;;  %s568_s5 = inlined_call_operand.hbm [shape: f32[2,8], index: 5, kind: output, shape index: {}]  }
   0x1   :  { %v59_v0 = vld [vmem:[%s564_s1 + $0x8] sm:$0xff]  ;;  %v61_v1 = vld [vmem:[%s564_s1 + $0x18] sm:$0xff]  ;;  %v58_v2 = vld [vmem:[%s564_s1] sm:$0xff]  ;;  %26 = vst.msk [vmem:[#allocation2] sm:$0x3] %vm25_vm0, %v382_v7  ;;  %145 = vmatprep.mubr.f32.mxu0 %v382_v7 }
   0x2   :  { %v316_v3 = vpack.c.bf16 %v61_v1, %v59_v0  ;;  %v60_v4 = vld [vmem:[%s564_s1 + $0x10] sm:$0xff]  ;;  %v63_v5 = vld [vmem:[%s564_s1 + $0x28] sm:$0xff]  ;;  %v65_v6 = vld [vmem:[%s564_s1 + $0x38] sm:$0xff] }
   0x3   :  { %v318_v8 = vpack.c.bf16 %v60_v4, %v58_v2  ;;  %v320_v9 = vpack.c.bf16 %v65_v6, %v63_v5  ;;  %v62_v10 = vld [vmem:[%s564_s1 + $0x20] sm:$0xff]  ;;  %v64_v11 = vld [vmem:[%s564_s1 + $0x30] sm:$0xff]  ;;  %v29_v13 = vld [vmem:[%s563_s0 + $0x8] sm:$0xff] }
   0x4   :  { %v28_v12 = vld [vmem:[%s563_s0] sm:$0xff]  ;;  %317 = vmatprep.subr.bf16.mxu0 %v316_v3  ;;  %v171_v16 = vld [vmem:[%s566_s3 + $0x88] sm:$0xff]  ;;  %v322_v17 = vpack.c.bf16 %v64_v11, %v62_v10  ;;  %v38_v19 = vsel %vm30_vm1, %v29_v13, 0.0  ;;  %v172_v23 = vld [vmem:[%s566_s3 + $0x90] sm:$0xff] }
   0x5   :  { %v31_v14 = vsel %vm30_vm1, %v28_v12, 0.0  ;;  %v170_v15 = vld [vmem:[%s566_s3 + $0x80] sm:$0xff]  ;;  %319 = vmatpush1.bf16.msra.mxu0 %v318_v8  ;;  %v155_v22 = vld [vmem:[%s566_s3 + $0x8] sm:$0xff]  ;;  %v39_v24 = vrot.slane %v38_v19, 4  ;;  %v173_v26 = vld [vmem:[%s566_s3 + $0x98] sm:$0xff] }
   0x6   :  { %v32_v18 = vrot.slane %v31_v14, 4  ;;  %v324_v20 = vpack.c.bf16 %v171_v16, %v170_v15  ;;  %v154_v21 = vld [vmem:[%s566_s3] sm:$0xff]  ;;  %321 = vmatprep.subr.bf16.mxu0 %v320_v9  ;;  %v156_v27 = vld [vmem:[%s566_s3 + $0x10] sm:$0xff]  ;;  %v157_v28 = vld [vmem:[%s566_s3 + $0x18] sm:$0xff]  ;;  %v328_v30 = vpack.c.bf16 %v173_v26, %v172_v23 }
   0x7   :  { %v326_v25 = vpack.c.bf16 %v155_v22, %v154_v21  ;;  %v174_v31 = vld [vmem:[%s566_s3 + $0xa0] sm:$0xff]  ;;  %v175_v32 = vld [vmem:[%s566_s3 + $0xa8] sm:$0xff]  ;;  %v40_v33 = vadd.f32 %v39_v24, %v38_v19  ;;  %v330_v34 = vpack.c.bf16 %v157_v28, %v156_v27  ;;  %v176_v40 = vld [vmem:[%s566_s3 + $0xb0] sm:$0xff] }
   0x8   :  { %v33_v29 = vadd.f32 %v32_v18, %v31_v14  ;;  %325 = vmatprep.subr.bf16.mxu1 %v324_v20  ;;  %v332_v36 = vpack.c.bf16 %v175_v32, %v174_v31  ;;  %v158_v37 = vld [vmem:[%s566_s3 + $0x20] sm:$0xff]  ;;  %v159_v38 = vld [vmem:[%s566_s3 + $0x28] sm:$0xff]  ;;  %v177_v41 = vld [vmem:[%s566_s3 + $0xb8] sm:$0xff] }
   0x9   :  { %327 = vmatpush3.bf16.msra.mxu1 %v326_v25  ;;  %323 = vmatpush1.bf16.msra.mxu0 %v322_v17  ;;  %v41_v39 = vrot.slane %v40_v33, 2  ;;  %v334_v44 = vpack.c.bf16 %v159_v38, %v158_v37  ;;  %v336_v46 = vpack.c.bf16 %v177_v41, %v176_v40  ;;  %v160_v47 = vld [vmem:[%s566_s3 + $0x30] sm:$0xff]  ;;  %v161_v48 = vld [vmem:[%s566_s3 + $0x38] sm:$0xff] }
   0xa   :  { %v34_v35 = vrot.slane %v33_v29, 2  ;;  %329 = vmatprep.subr.bf16.mxu1 %v328_v30 }
   0xb   :  { %v42_v43 = vadd.f32 %v41_v39, %v40_v33 }
   0xc   :  { %v35_v42 = vadd.f32 %v34_v35, %v33_v29 }
   0xd   :  { %331 = vmatpush3.bf16.msra.mxu1 %v330_v34 }
   0xe   :  { %v36_v45 = vrot.slane %v35_v42, 1  ;;  %333 = vmatprep.subr.bf16.mxu1 %v332_v36 }
   0xf   :  { %10 = vsyncpa [#allocation4], 0  ;;  %v43_v49 = vrot.slane %v42_v43, 1  ;;  %v178_v50 = vld [vmem:[%s566_s3 + $0xc0] sm:$0xff]  ;;  %v179_v51 = vld [vmem:[%s566_s3 + $0xc8] sm:$0xff]  ;;  %vm47_vm2 = vcmask 1041409   ;;  %v338_v55 = vpack.c.bf16 %v161_v48, %v160_v47  ;;  %v68_v18 = vlaneseq }
  0x10   :  { %v37_v52 = vadd.f32 %v36_v45, %v35_v42  ;;  %v27_v53 = vld [vmem:[#allocation2] sm:$0x3]  ;;  %v340_v56 = vpack.c.bf16 %v179_v51, %v178_v50  ;;  %v163_v58 = vld [vmem:[%s566_s3 + $0x48] sm:$0xff]  ;;  %v180_v60 = vld [vmem:[%s566_s3 + $0xd0] sm:$0xff]  ;;  %s383_s24 = smov [#allocation3]   ;;  %vm263_vm3 = vcmask 58368  }
  0x11   :  { %v44_v54 = vadd.f32 %v43_v49, %v42_v43  ;;  %335 = vmatpush3.bf16.msra.mxu1 %v334_v44  ;;  %v162_v57 = vld [vmem:[%s566_s3 + $0x40] sm:$0xff]  ;;  %v181_v61 = vld [vmem:[%s566_s3 + $0xd8] sm:$0xff]  ;;  %v164_v1 = vld [vmem:[%s566_s3 + $0x50] sm:$0xff]  ;;  %v69_v19 = vshrl.u32 %v68_v18, 7  ;;  %s271_s25 = sshll.u32 %s383_s24, 4  ;;  %s272_s25 = int_to_ptr.vmem [resolvable:$true] %s271_s25 }
  0x12   :  { %337 = vmatprep.subr.bf16.mxu1 %v336_v46  ;;  %v342_v63 = vpack.c.bf16 %v163_v58, %v162_v57  ;;  %v344_v0 = vpack.c.bf16 %v181_v61, %v180_v60  ;;  %v165_v2 = vld [vmem:[%s566_s3 + $0x58] sm:$0xff]  ;;  %v182_v3 = vld [vmem:[%s566_s3 + $0xe0] sm:$0xff]  ;;  %v183_v4 = vld [vmem:[%s566_s3 + $0xe8] sm:$0xff]  ;;  %p363_p1 = scmp.lt.s32.totalorder %s272_s25, %s272_s25 }
  0x13   :  { %v48_v59 = vsel %vm47_vm2, %v44_v54, %v37_v52  ;;  %v346_v5 = vpack.c.bf16 %v165_v2, %v164_v1  ;;  %v348_v6 = vpack.c.bf16 %v183_v4, %v182_v3  ;;  %v166_v9 = vld [vmem:[%s566_s3 + $0x60] sm:$0xff]  ;;  %v167_v10 = vld [vmem:[%s566_s3 + $0x68] sm:$0xff]  ;;  %v184_v12 = vld [vmem:[%s566_s3 + $0xf0] sm:$0xff]  ;;  %v70_v20 = vsub.s32 0, %v69_v19 }
  0x14   :  { %v50_v62 = vadd.f32 %v48_v59, %v27_v53  ;;  %v350_v11 = vpack.c.bf16 %v167_v10, %v166_v9  ;;  %v185_v13 = vld [vmem:[%s566_s3 + $0xf8] sm:$0xff]  ;;  %v168_v15 = vld [vmem:[%s566_s3 + $0x70] sm:$0xff]  ;;  %v66_v21 = vld [vmem:[%s565_s2] sm:$0x3]  ;;  %v74_v22 = vsub.s32 1, %v69_v19  ;;  %s358_s2 = scalar_lea.vmem %s272_s25, 32 }
  0x15   :  { %339 = vmatpush3.bf16.msra.mxu1 %v338_v55  ;;  %v352_v14 = vpack.c.bf16 %v185_v13, %v184_v12  ;;  %v169_v16 = vld [vmem:[%s566_s3 + $0x78] sm:$0xff]  ;;  %v71_v23 = vrot.slane %v66_v21, %v70_v20  ;;  %v280_v32 = vld [vmem:[%s567_s4] ss:$0 sm:$0xff]  ;;  %p359_p0 = scmp.ne.s32.totalorder %s272_s25, %s358_s2  ;;  %p364_p2 = scmp.lt.s32.totalorder %s358_s2, %s358_s2 }
  0x16   :  { %52 = vst.msk [vmem:[#allocation2] sm:$0x3] %vm25_vm0, %v50_v62  ;;  %341 = vmatprep.subr.bf16.mxu1 %v340_v56  ;;  %v354_v17 = vpack.c.bf16 %v169_v16, %v168_v15  ;;  %v75_v24 = vrot.slane %v66_v21, %v74_v22 }
  0x17   :  { %p365_p3 = por %p364_p2, %p363_p1 }
  0x19   :  { %343 = vmatpush3.bf16.msra.mxu1 %v342_v63  ;;  %p366_p4 = pnand %p365_p3, %p359_p0 }
  0x1a   :  { %345 = vmatprep.subr.bf16.mxu1 %v344_v0 }
  0x1d   :  { %v56_v7 = vld [vmem:[#allocation2] sm:$0x3]  ;;  %347 = vmatpush3.bf16.msra.mxu1 %v346_v5 }
  0x1e   :  { %v57_v8 = vmul.f32 0.125, %v56_v7  ;;  %349 = vmatprep.subr.bf16.mxu1 %v348_v6 }
  0x20   :  { %279 = vmatmul.mubr.msk.f32.vlgmr.msra.gmra.mrb[0].mxu0 %vm30_vm1, %v57_v8 }
  0x21   :  { %351 = vmatpush3.bf16.msra.mxu1 %v350_v11 }
  0x22   :  { %353 = vmatprep.subr.bf16.mxu1 %v352_v14 }
  0x25   :  { %355 = vmatpush3.bf16.msra.mxu1 %v354_v17 }
  0xf3   :  { %v147_v25 = vpop.f32.mrb[0].mxu0 }
  0xf4   :  { %v148_v26 = vadd.f32 %v147_v25, %v71_v23  ;;  %v149_v27 = vpop.f32.mrb[1].mxu0 }
  0xf5   :  { %v150_v28 = vadd.f32 %v149_v27, %v75_v24 }
  0xf6   :  { %v152_v30 = vmax.f32 %v148_v26, 0.0 }
  0xf7   :  { %v153_v29 = vmax.f32 %v150_v28, 0.0 }
  0xf9   :  { %257 = vmatprep.mubr.f32.mxu1 %v153_v29 }
  0xfa   :  { %258 = vmatmul.mubr.f32.vlgmr.msra.gmra.mrb[0].mxu1 %v152_v30 }
 0x1cd   :  { %v313_v31 = vpop.f32.mrb[0].mxu1 }
 0x1ce   :  { %v314_v33 = vpop.f32.mrb[1].mxu1 }
 0x1cf   :  { %v315_v34 = vadd.f32 %v314_v33, %v313_v31 }
 0x1d1   :  { %v260_v35 = vadd.f32 %v315_v34, %v280_v32 }
 0x1d3   :  { %264 = vst.msk [vmem:[#allocation3] sm:$0x3] %vm263_vm3, %v260_v35 }
 0x1d4   :  { %369 = shalt.err (!%p366_p4)
}
 0x1d5   :  { %s370_s28 = scalar_lea.hbm %s568_s5, 32 }
 0x1d6   :  { %p371_p5 = scmp.ne.s32.totalorder %s568_s5, %s370_s28  ;;  %p374_p6 = scmp.lt.u32.totalorder %s370_s28, %s568_s5 }
 0x1d8   :  { %p376_p7 = pnand %p374_p6, %p371_p5 }
 0x1da   :  { %379 = shalt.err (!%p376_p7)
}
 0x1db   :  { %274 = dma.vmem_to_hbm [thread:$0]  %s272_s25, 32, %s568_s5, [#allocation4]  }
 0x1dc   :  { %380 = dma.done.wait [#allocation4], 32  }
 0x1dd   :  { %381 = vsyncadd [#allocation4], 4294967264 }
 0x1de   :  { %278 = vsyncpa [#allocation4], 1 }

</bundles_post_ra>
